<compile_context>
chip_gen: v7x
topology: tpu7x:2x2x1
jax: 0.10.0
libtpu: 0.0.40
codegen_flags: <defaults>
</compile_context>

<pallas_src>
import math

import jax
import jax.numpy as jnp
from jax import lax
from jax.experimental import pallas as pl
from jax.experimental.pallas import tpu as pltpu


def _const_spec(shape):
    """BlockSpec for a grid-invariant operand: constant index_map, single buffer."""
    return pl.BlockSpec(shape, lambda *_: (0,) * len(shape),
                        pipeline_mode=pl.Buffered(1))


def _default_vmem_limit():
    """~3/4 of physical VMEM (capped at 100 MiB), 48 MiB fallback."""
    try:
        cap = int(pltpu.get_tpu_info().vmem_capacity_bytes)
    except Exception:
        cap = 64 * 1024 * 1024
    return max(32 * 1024 * 1024, min((cap * 3) // 4, 100 * 1024 * 1024))


# ---------------------------------------------------------------------------
# Kernel A: i_dense (u|v fused + qk) + swish + OffsetScale (+ folded q scaling)
# ---------------------------------------------------------------------------
def _gau_proj_kernel(x_ref, wuv_ref, wqk_ref, buv_ref, bqk_ref,
                     gamma_ref, beta_ref, qscale_ref,
                     u_ref, v_ref, q_ref, k_ref):
    b = pl.program_id(0)
    e = u_ref.shape[-1]
    x = x_ref[0]                                   # (TL, H), compute dtype

    # Fused u|v projection: one (H, 2E) matmul, one bias add, one swish.
    huv = jnp.dot(x, wuv_ref[...], preferred_element_type=jnp.float32)
    huv = huv + buv_ref[...]
    huv = huv * jax.nn.sigmoid(huv)                # swish, f32   (TL, 2E)

    hqk = jnp.dot(x, wqk_ref[...], preferred_element_type=jnp.float32)
    hqk = hqk + bqk_ref[...]
    hqk = hqk * jax.nn.sigmoid(hqk)                # (TL, S)

    u_ref[0] = huv[:, :e].astype(u_ref.dtype)
    v_ref[0] = huv[:, e:].astype(v_ref.dtype)

    # OffsetScale (heads=2 -> q, k); fold (1/sqrt(S)) * log(l)/log(512) into q.
    qscale = qscale_ref[b]                         # per-batch scalar from SMEM
    q_ref[0] = ((hqk * gamma_ref[0:1, :] + beta_ref[0:1, :]) * qscale
                ).astype(q_ref.dtype)
    k_ref[0] = (hqk * gamma_ref[1:2, :] + beta_ref[1:2, :]).astype(k_ref.dtype)


# ---------------------------------------------------------------------------
# Kernel B: flash-style attention + softmax(_plus) + gating + o_dense
# ---------------------------------------------------------------------------
def _gau_attn_kernel(kvlim_ref, q_ref, k_ref, v_ref, u_ref, bias_ref,
                     wo_ref, bo_ref, o_ref, m_sc, l_sc, acc_sc):
    b = pl.program_id(0)
    ki = pl.program_id(2)
    tk = k_ref.shape[1]

    @pl.when(ki == 0)
    def _():
        m_sc[...] = jnp.full(m_sc.shape, -jnp.inf, dtype=m_sc.dtype)
        l_sc[...] = jnp.zeros(l_sc.shape, dtype=l_sc.dtype)
        acc_sc[...] = jnp.zeros(acc_sc.shape, dtype=acc_sc.dtype)

    # Skip k-tiles that lie entirely past the last valid key of this batch.
    @pl.when(ki * tk < kvlim_ref[b])
    def _():
        # Contract on the last dim of both operands -> no explicit k transpose.
        s = lax.dot_general(q_ref[0], k_ref[0], (((1,), (1,)), ((), ())),
                            preferred_element_type=jnp.float32)     # (TQ, TK)
        s = s + bias_ref[0]                        # (1, TK) additive mask bias

        m_prev = m_sc[...]
        m_new = jnp.maximum(m_prev, jnp.max(s, axis=-1, keepdims=True))
        alpha = jnp.exp(m_prev - m_new)
        p = jnp.exp(s - m_new)                     # (TQ, TK) f32
        l_sc[...] = alpha * l_sc[...] + jnp.sum(p, axis=-1, keepdims=True)
        acc_sc[...] = alpha * acc_sc[...] + jnp.dot(
            p.astype(v_ref.dtype), v_ref[0], preferred_element_type=jnp.float32)
        m_sc[...] = m_new

    @pl.when(ki == pl.num_programs(2) - 1)
    def _():
        av = acc_sc[...] / l_sc[...]               # exact f32 normalization
        gated = (u_ref[0].astype(jnp.float32) * av).astype(wo_ref.dtype)
        out = jnp.dot(gated, wo_ref[...], preferred_element_type=jnp.float32)
        out = out + bo_ref[...]
        o_ref[0] = out.astype(o_ref.dtype)


# ---------------------------------------------------------------------------
# Wrapper
# ---------------------------------------------------------------------------
def gated_attention(hidden_states, attention_mask, params, *,
                    inter_size, key_size,
                    block_l=512, block_q=512, block_k=512,
                    compute_dtype=jnp.bfloat16, vmem_limit_bytes=None):
    """hidden_states: [B, L, H] f32, attention_mask: [B, 1, 1, L] f32."""
    B, L, H = hidden_states.shape
    E, S = inter_size, key_size

    tl, tq, tk = min(block_l, L), min(block_q, L), min(block_k, L)
    # v7x megacore balance: keep the parallel grid extent >= 2 when cheap.
    while B * (L // tq) < 2 and tq > 128 and L % (tq // 2) == 0:
        tq //= 2
    while B * (L // tl) < 2 and tl > 128 and L % (tl // 2) == 0:
        tl //= 2
    assert L % tl == 0 and L % tq == 0 and L % tk == 0, "L must divide tiles"

    if vmem_limit_bytes is None:
        vmem_limit_bytes = _default_vmem_limit()

    wi, bi = params["wi"], params["bi"]
    gamma, beta = params["gamma"], params["beta"]
    wo, bo = params["wo"], params["bo"]

    # Lane-aligned split of the fused i_dense weight: u|v stay fused, qk separate.
    wuv, wqk = wi[:, :2 * E], wi[:, 2 * E:2 * E + S]
    buv, bqk = bi[:, :2 * E], bi[:, 2 * E:2 * E + S]

    cd = compute_dtype
    cd_bytes = jnp.dtype(cd).itemsize
    x = hidden_states.astype(cd)
    wuv_c, wqk_c, wo_c = wuv.astype(cd), wqk.astype(cd), wo.astype(cd)
    buv_f, bqk_f = buv.astype(jnp.float32), bqk.astype(jnp.float32)
    gamma_f, beta_f = gamma.astype(jnp.float32), beta.astype(jnp.float32)
    bo_f = bo.astype(jnp.float32)

    # softmax_plus length: depends only on the key mask -> one scalar per batch.
    mask = attention_mask.reshape(B, 1, L).astype(jnp.float32)   # == .squeeze(1)
    mask2d = mask[:, 0, :]
    l_valid = jnp.maximum(jnp.sum(mask2d, axis=-1, keepdims=True), 1.0)  # (B, 1)
    c = jnp.log(l_valid) / math.log(512.0)                               # (B, 1)
    qscale = (c[:, 0] / math.sqrt(S)).astype(jnp.float32)                # (B,)
    # Precomputed additive mask bias, pre-scaled by c (matches (s+m)*c).
    bias = ((1.0 - mask) * jnp.float32(-1e12)
            * c[:, :, None]).astype(jnp.float32)                         # (B,1,L)

    # Furthest valid key (+1) per batch -> lets kernel B skip fully-padded
    # k-tiles (exact: their probabilities underflow to 0).  Degenerate batches
    # (c == 0 -> bias is 0 everywhere) use the full extent to match the
    # reference's uniform-attention behaviour.
    pos = jnp.arange(L, dtype=jnp.int32)
    kv_limit = jnp.max(jnp.where(mask2d > 0.5, pos + 1, 0), axis=-1)
    kv_limit = jnp.where((kv_limit == 0) | (c[:, 0] <= 0.0), L, kv_limit)
    kv_limit = kv_limit.astype(jnp.int32)

    # ---------------- Kernel A: projections ----------------
    ce_a = pl.CostEstimate(
        flops=2 * B * L * H * (2 * E + S),
        transcendentals=B * L * (2 * E + S),
        bytes_accessed=(B * L * H + H * (2 * E + S)
                        + B * L * (2 * E + 2 * S)) * cd_bytes)

    u, v, q, k = pl.pallas_call(
        _gau_proj_kernel,
        out_shape=(
            jax.ShapeDtypeStruct((B, L, E), cd),
            jax.ShapeDtypeStruct((B, L, E), cd),
            jax.ShapeDtypeStruct((B, L, S), cd),
            jax.ShapeDtypeStruct((B, L, S), cd),
        ),
        grid_spec=pltpu.PrefetchScalarGridSpec(
            num_scalar_prefetch=0,
            grid=(B, L // tl),
            in_specs=[
                pl.BlockSpec((1, tl, H), lambda b, i: (b, i, 0)),   # x
                _const_spec((H, 2 * E)),                            # Wi_uv
                _const_spec((H, S)),                                # Wi_qk
                _const_spec((1, 2 * E)),                            # b_uv
                _const_spec((1, S)),                                # b_qk
                _const_spec((2, S)),                                # gamma
                _const_spec((2, S)),                                # beta
                pl.BlockSpec(memory_space=pltpu.MemorySpace.SMEM),  # qscale
            ],
            out_specs=[
                pl.BlockSpec((1, tl, E), lambda b, i: (b, i, 0)),   # u
                pl.BlockSpec((1, tl, E), lambda b, i: (b, i, 0)),   # v
                pl.BlockSpec((1, tl, S), lambda b, i: (b, i, 0)),   # q
                pl.BlockSpec((1, tl, S), lambda b, i: (b, i, 0)),   # k
            ],
        ),
        compiler_params=pltpu.CompilerParams(
            dimension_semantics=("parallel", "parallel"),
            vmem_limit_bytes=vmem_limit_bytes),
        cost_estimate=ce_a,
    )(x, wuv_c, wqk_c, buv_f, bqk_f, gamma_f, beta_f, qscale)

    # ---------------- Kernel B: flash attention + gate + o_dense ----------------
    n_qtiles = L // tq
    ce_b = pl.CostEstimate(
        flops=2 * B * L * L * (S + E) + 2 * B * L * E * H,
        transcendentals=B * L * L,
        bytes_accessed=((B * L * (S + E))                  # q + u (read once)
                        + n_qtiles * B * L * (S + E)       # k + v re-streams
                        + E * H) * cd_bytes
                       + n_qtiles * B * L * 4              # mask bias (f32)
                       + B * L * H * hidden_states.dtype.itemsize)

    out = pl.pallas_call(
        _gau_attn_kernel,
        out_shape=jax.ShapeDtypeStruct((B, L, H), hidden_states.dtype),
        grid_spec=pltpu.PrefetchScalarGridSpec(
            num_scalar_prefetch=1,                               # kv_limit
            grid=(B, L // tq, L // tk),
            in_specs=[
                pl.BlockSpec((1, tq, S), lambda b, qi, ki, kv: (b, qi, 0)),  # q
                pl.BlockSpec((1, tk, S), lambda b, qi, ki, kv: (b, ki, 0)),  # k
                pl.BlockSpec((1, tk, E), lambda b, qi, ki, kv: (b, ki, 0)),  # v
                pl.BlockSpec((1, tq, E), lambda b, qi, ki, kv: (b, qi, 0)),  # u
                pl.BlockSpec((1, 1, tk), lambda b, qi, ki, kv: (b, 0, ki)),  # bias
                _const_spec((E, H)),                                         # Wo
                _const_spec((1, H)),                                         # bo
            ],
            out_specs=pl.BlockSpec((1, tq, H), lambda b, qi, ki, kv: (b, qi, 0)),
            scratch_shapes=[
                pltpu.VMEM((tq, 1), jnp.float32),   # running max
                pltpu.VMEM((tq, 1), jnp.float32),   # running sum
                pltpu.VMEM((tq, E), jnp.float32),   # running accumulator
            ],
        ),
        compiler_params=pltpu.CompilerParams(
            dimension_semantics=("parallel", "parallel", "arbitrary"),
            vmem_limit_bytes=vmem_limit_bytes),
        cost_estimate=ce_b,
    )(kv_limit, q, k, v, u, bias, wo_c, bo_f)
    return out


# ---------------------------------------------------------------------------
# Pure-JAX reference (mirrors the PyTorch forward exactly)
# ---------------------------------------------------------------------------
def gated_attention_ref(hidden_states, attention_mask, params,
                        *, inter_size, key_size):
    wi, bi, gamma, beta, wo, bo = (params["wi"], params["bi"], params["gamma"],
                                   params["beta"], params["wo"], params["bo"])
    h = hidden_states @ wi + bi[0]
    h = h * jax.nn.sigmoid(h)                         # swish
    u = h[..., :inter_size]
    v = h[..., inter_size:2 * inter_size]
    qk = h[..., 2 * inter_size:]
    q = qk * gamma[0] + beta[0]
    k = qk * gamma[1] + beta[1]
    scores = jnp.einsum("bid,bjd->bij", q, k) / math.sqrt(key_size)
    add_mask = (1.0 - attention_mask) * -1e12
    scores = scores + add_mask.squeeze(1)
    valid = (scores > -1e11).astype(jnp.float32)
    l = jnp.maximum(jnp.sum(valid, axis=-1, keepdims=True), 1.0)
    scores = scores * jnp.log(l) / math.log(512.0)
    attn = jax.nn.softmax(scores, axis=-1)
    out = (u * jnp.einsum("bij,bjd->bid", attn, v)) @ wo + bo[0]
    return out


# ---------------------------------------------------------------------------
if __name__ == "__main__":
    B, L, H = 2, 8, 32        # batch, seq, hidden_size
    KEY = 16                  # attention_key_size
    INTER = 32                # intermediate_size
    D = 2 * INTER + KEY

    key = jax.random.PRNGKey(0)
    k_x, k_wi, k_bi, k_g, k_wo, k_bo = jax.random.split(key, 6)

    x = jax.random.normal(k_x, (B, L, H), dtype=jnp.float32)

    # attention mask [B, 1, 1, L]: batch 0 fully valid, batch 1 has 2 pad tokens
    mask = jnp.ones((B, 1, 1, L), dtype=jnp.float32)
    mask = mask.at[1, :, :, L - 2:].set(0.0)

    params = {
        "wi": jax.random.normal(k_wi, (H, D), dtype=jnp.float32) * 0.05,
        "bi": jax.random.normal(k_bi, (1, D), dtype=jnp.float32) * 0.02,
        "gamma": jax.random.normal(k_g, (2, KEY), dtype=jnp.float32) * 0.02,
        "beta": jnp.zeros((2, KEY), dtype=jnp.float32),
        "wo": jax.random.normal(k_wo, (INTER, H), dtype=jnp.float32) * 0.05,
        "bo": jax.random.normal(k_bo, (1, H), dtype=jnp.float32) * 0.02,
    }

    ref = gated_attention_ref(x, mask, params, inter_size=INTER, key_size=KEY)

    # f32 compute path: tight tolerance against the reference.
    out_f32 = gated_attention(x, mask, params, inter_size=INTER, key_size=KEY,
                              compute_dtype=jnp.float32)
    out_f32 = jax.block_until_ready(out_f32)
    assert out_f32.shape == (B, L, H)
    assert jnp.allclose(out_f32, ref, atol=1e-4, rtol=1e-4), (
        f"f32 max abs err = {jnp.max(jnp.abs(out_f32 - ref))}")

    # bf16 default path (MXU-native inputs, f32 accumulation): loose tolerance.
    out_bf16 = gated_attention(x, mask, params, inter_size=INTER, key_size=KEY)
    out_bf16 = jax.block_until_ready(out_bf16)
    assert out_bf16.shape == (B, L, H)
    assert jnp.allclose(out_bf16, ref, atol=2e-2, rtol=2e-2), (
        f"bf16 max abs err = {jnp.max(jnp.abs(out_bf16 - ref))}")

    print("KERNEL_OK")
</pallas_src>

<mosaic_0001>
module attributes {stable_mosaic.version = 11 : i64} {
  func.func @_gau_proj_kernel(%arg0: i32, %arg1: i32, %arg2: memref<1x8x32xf32, #tpu.memory_space<vmem>>, %arg3: memref<32x64xf32, #tpu.memory_space<vmem>>, %arg4: memref<32x16xf32, #tpu.memory_space<vmem>>, %arg5: memref<1x64xf32, #tpu.memory_space<vmem>>, %arg6: memref<1x16xf32, #tpu.memory_space<vmem>>, %arg7: memref<2x16xf32, #tpu.memory_space<vmem>>, %arg8: memref<2x16xf32, #tpu.memory_space<vmem>>, %arg9: memref<2xf32, #tpu.memory_space<smem>>, %arg10: memref<1x8x32xf32, #tpu.memory_space<vmem>>, %arg11: memref<1x8x32xf32, #tpu.memory_space<vmem>>, %arg12: memref<1x8x16xf32, #tpu.memory_space<vmem>>, %arg13: memref<1x8x16xf32, #tpu.memory_space<vmem>>) attributes {dimension_semantics = [#tpu.dimension_semantics<parallel>, #tpu.dimension_semantics<parallel>], iteration_bounds = array<i64: 2, 1>, scalar_prefetch = 0 : i64, scratch_operands = 0 : i64, tpu.core_type = #tpu.core_type<tc>, window_params = [{transform_indices = @transform_0, window_bounds = array<i64: 1, 8, 32>}, {pipeline_mode = #tpu.pipeline_mode<synchronous>, transform_indices = @transform_1, window_bounds = array<i64: 32, 64>}, {pipeline_mode = #tpu.pipeline_mode<synchronous>, transform_indices = @transform_2, window_bounds = array<i64: 32, 16>}, {pipeline_mode = #tpu.pipeline_mode<synchronous>, transform_indices = @transform_3, window_bounds = array<i64: 1, 64>}, {pipeline_mode = #tpu.pipeline_mode<synchronous>, transform_indices = @transform_4, window_bounds = array<i64: 1, 16>}, {pipeline_mode = #tpu.pipeline_mode<synchronous>, transform_indices = @transform_5, window_bounds = array<i64: 2, 16>}, {pipeline_mode = #tpu.pipeline_mode<synchronous>, transform_indices = @transform_6, window_bounds = array<i64: 2, 16>}, {transform_indices = @transform_7, window_bounds = array<i64: 2>}, {transform_indices = @transform_8, window_bounds = array<i64: 1, 8, 32>}, {transform_indices = @transform_9, window_bounds = array<i64: 1, 8, 32>}, {transform_indices = @transform_10, window_bounds = array<i64: 1, 8, 16>}, {transform_indices = @transform_11, window_bounds = array<i64: 1, 8, 16>}]} {
    %c0 = arith.constant 0 : index
    %c0_0 = arith.constant 0 : index
    %c0_1 = arith.constant 0 : index
    %0 = vector.load %arg2[%c0, %c0_0, %c0_1] : memref<1x8x32xf32, #tpu.memory_space<vmem>>, vector<1x8x32xf32>
    %1 = vector.shape_cast %0 : vector<1x8x32xf32> to vector<8x32xf32>
    %c0_2 = arith.constant 0 : index
    %c0_3 = arith.constant 0 : index
    %2 = vector.load %arg3[%c0_2, %c0_3] : memref<32x64xf32, #tpu.memory_space<vmem>>, vector<32x64xf32>
    %cst = arith.constant dense<0.000000e+00> : vector<8x64xf32>
    %3 = tpu.matmul %1, %2, %cst {dimension_numbers = #tpu.dot_dimension_numbers<[1], [0], [0], [1], [0, 0, 1, 1], [], []>} : vector<8x32xf32>, vector<32x64xf32>, vector<8x64xf32> -> vector<8x64xf32>
    %c0_4 = arith.constant 0 : index
    %c0_5 = arith.constant 0 : index
    %4 = vector.load %arg5[%c0_4, %c0_5] : memref<1x64xf32, #tpu.memory_space<vmem>>, vector<1x64xf32>
    %5 = vector.broadcast %4 : vector<1x64xf32> to vector<8x64xf32>
    %6 = arith.addf %3, %5 : vector<8x64xf32>
    %7 = arith.negf %6 : vector<8x64xf32>
    %8 = math.exp %7 : vector<8x64xf32>
    %cst_6 = arith.constant 1.000000e+00 : f32
    %9 = vector.broadcast %cst_6 : f32 to vector<8x64xf32>
    %10 = arith.addf %9, %8 : vector<8x64xf32>
    %11 = arith.divf %9, %10 : vector<8x64xf32>
    %12 = arith.mulf %6, %11 : vector<8x64xf32>
    %c0_7 = arith.constant 0 : index
    %c0_8 = arith.constant 0 : index
    %13 = vector.load %arg4[%c0_7, %c0_8] : memref<32x16xf32, #tpu.memory_space<vmem>>, vector<32x16xf32>
    %cst_9 = arith.constant dense<0.000000e+00> : vector<8x16xf32>
    %14 = tpu.matmul %1, %13, %cst_9 {dimension_numbers = #tpu.dot_dimension_numbers<[1], [0], [0], [1], [0, 0, 1, 1], [], []>} : vector<8x32xf32>, vector<32x16xf32>, vector<8x16xf32> -> vector<8x16xf32>
    %c0_10 = arith.constant 0 : index
    %c0_11 = arith.constant 0 : index
    %15 = vector.load %arg6[%c0_10, %c0_11] : memref<1x16xf32, #tpu.memory_space<vmem>>, vector<1x16xf32>
    %16 = vector.broadcast %15 : vector<1x16xf32> to vector<8x16xf32>
    %17 = arith.addf %14, %16 : vector<8x16xf32>
    %18 = arith.negf %17 : vector<8x16xf32>
    %19 = math.exp %18 : vector<8x16xf32>
    %cst_12 = arith.constant 1.000000e+00 : f32
    %20 = vector.broadcast %cst_12 : f32 to vector<8x16xf32>
    %21 = arith.addf %20, %19 : vector<8x16xf32>
    %22 = arith.divf %20, %21 : vector<8x16xf32>
    %23 = arith.mulf %17, %22 : vector<8x16xf32>
    %24 = vector.extract_strided_slice %12 {offsets = [0, 0], sizes = [8, 32], strides = [1, 1]} : vector<8x64xf32> to vector<8x32xf32>
    %c0_13 = arith.constant 0 : index
    %c0_14 = arith.constant 0 : index
    %c0_15 = arith.constant 0 : index
    %25 = vector.load %arg10[%c0_13, %c0_14, %c0_15] : memref<1x8x32xf32, #tpu.memory_space<vmem>>, vector<1x8x32xf32>
    %26 = vector.shape_cast %25 : vector<1x8x32xf32> to vector<8x32xf32>
    %27 = vector.shape_cast %24 : vector<8x32xf32> to vector<1x8x32xf32>
    tpu.vector_store %arg10[%c0_13, %c0_14, %c0_15], %27 {strides = array<i32>} : memref<1x8x32xf32, #tpu.memory_space<vmem>>, vector<1x8x32xf32>,
    %28 = vector.extract_strided_slice %12 {offsets = [0, 32], sizes = [8, 32], strides = [1, 1]} : vector<8x64xf32> to vector<8x32xf32>
    %c0_16 = arith.constant 0 : index
    %c0_17 = arith.constant 0 : index
    %c0_18 = arith.constant 0 : index
    %29 = vector.load %arg11[%c0_16, %c0_17, %c0_18] : memref<1x8x32xf32, #tpu.memory_space<vmem>>, vector<1x8x32xf32>
    %30 = vector.shape_cast %29 : vector<1x8x32xf32> to vector<8x32xf32>
    %31 = vector.shape_cast %28 : vector<8x32xf32> to vector<1x8x32xf32>
    tpu.vector_store %arg11[%c0_16, %c0_17, %c0_18], %31 {strides = array<i32>} : memref<1x8x32xf32, #tpu.memory_space<vmem>>, vector<1x8x32xf32>,
    %32 = arith.index_cast %arg0 : i32 to index
    %33 = memref.load %arg9[%32] : memref<2xf32, #tpu.memory_space<smem>>
    %c0_19 = arith.constant 0 : index
    %c0_20 = arith.constant 0 : index
    %34 = vector.load %arg7[%c0_19, %c0_20] : memref<2x16xf32, #tpu.memory_space<vmem>>, vector<1x16xf32>
    %35 = vector.broadcast %34 : vector<1x16xf32> to vector<8x16xf32>
    %36 = arith.mulf %23, %35 : vector<8x16xf32>
    %c0_21 = arith.constant 0 : index
    %c0_22 = arith.constant 0 : index
    %37 = vector.load %arg8[%c0_21, %c0_22] : memref<2x16xf32, #tpu.memory_space<vmem>>, vector<1x16xf32>
    %38 = vector.broadcast %37 : vector<1x16xf32> to vector<8x16xf32>
    %39 = arith.addf %36, %38 : vector<8x16xf32>
    %40 = vector.broadcast %33 : f32 to vector<8x16xf32>
    %41 = arith.mulf %39, %40 : vector<8x16xf32>
    %c0_23 = arith.constant 0 : index
    %c0_24 = arith.constant 0 : index
    %c0_25 = arith.constant 0 : index
    %42 = vector.load %arg12[%c0_23, %c0_24, %c0_25] : memref<1x8x16xf32, #tpu.memory_space<vmem>>, vector<1x8x16xf32>
    %43 = vector.shape_cast %42 : vector<1x8x16xf32> to vector<8x16xf32>
    %44 = vector.shape_cast %41 : vector<8x16xf32> to vector<1x8x16xf32>
    tpu.vector_store %arg12[%c0_23, %c0_24, %c0_25], %44 {strides = array<i32>} : memref<1x8x16xf32, #tpu.memory_space<vmem>>, vector<1x8x16xf32>,
    %c1 = arith.constant 1 : index
    %c0_26 = arith.constant 0 : index
    %45 = vector.load %arg7[%c1, %c0_26] : memref<2x16xf32, #tpu.memory_space<vmem>>, vector<1x16xf32>
    %46 = vector.broadcast %45 : vector<1x16xf32> to vector<8x16xf32>
    %47 = arith.mulf %23, %46 : vector<8x16xf32>
    %c1_27 = arith.constant 1 : index
    %c0_28 = arith.constant 0 : index
    %48 = vector.load %arg8[%c1_27, %c0_28] : memref<2x16xf32, #tpu.memory_space<vmem>>, vector<1x16xf32>
    %49 = vector.broadcast %48 : vector<1x16xf32> to vector<8x16xf32>
    %50 = arith.addf %47, %49 : vector<8x16xf32>
    %c0_29 = arith.constant 0 : index
    %c0_30 = arith.constant 0 : index
    %c0_31 = arith.constant 0 : index
    %51 = vector.load %arg13[%c0_29, %c0_30, %c0_31] : memref<1x8x16xf32, #tpu.memory_space<vmem>>, vector<1x8x16xf32>
    %52 = vector.shape_cast %51 : vector<1x8x16xf32> to vector<8x16xf32>
    %53 = vector.shape_cast %50 : vector<8x16xf32> to vector<1x8x16xf32>
    tpu.vector_store %arg13[%c0_29, %c0_30, %c0_31], %53 {strides = array<i32>} : memref<1x8x16xf32, #tpu.memory_space<vmem>>, vector<1x8x16xf32>,
    return
  }
  func.func @transform_0(%arg0: i32, %arg1: i32) -> (i32, i32, i32) {
    %c0_i32 = arith.constant 0 : i32
    %c0_i32_0 = arith.constant 0 : i32
    return %arg0, %arg1, %c0_i32 : i32, i32, i32
  }
  func.func @transform_1(%arg0: i32, %arg1: i32) -> (i32, i32) {
    %c0_i32 = arith.constant 0 : i32
    %c0_i32_0 = arith.constant 0 : i32
    %c0_i32_1 = arith.constant 0 : i32
    return %c0_i32, %c0_i32_0 : i32, i32
  }
  func.func @transform_2(%arg0: i32, %arg1: i32) -> (i32, i32) {
    %c0_i32 = arith.constant 0 : i32
    %c0_i32_0 = arith.constant 0 : i32
    %c0_i32_1 = arith.constant 0 : i32
    return %c0_i32, %c0_i32_0 : i32, i32
  }
  func.func @transform_3(%arg0: i32, %arg1: i32) -> (i32, i32) {
    %c0_i32 = arith.constant 0 : i32
    %c0_i32_0 = arith.constant 0 : i32
    %c0_i32_1 = arith.constant 0 : i32
    return %c0_i32, %c0_i32_0 : i32, i32
  }
  func.func @transform_4(%arg0: i32, %arg1: i32) -> (i32, i32) {
    %c0_i32 = arith.constant 0 : i32
    %c0_i32_0 = arith.constant 0 : i32
    %c0_i32_1 = arith.constant 0 : i32
    return %c0_i32, %c0_i32_0 : i32, i32
  }
  func.func @transform_5(%arg0: i32, %arg1: i32) -> (i32, i32) {
    %c0_i32 = arith.constant 0 : i32
    %c0_i32_0 = arith.constant 0 : i32
    %c0_i32_1 = arith.constant 0 : i32
    return %c0_i32, %c0_i32_0 : i32, i32
  }
  func.func @transform_6(%arg0: i32, %arg1: i32) -> (i32, i32) {
    %c0_i32 = arith.constant 0 : i32
    %c0_i32_0 = arith.constant 0 : i32
    %c0_i32_1 = arith.constant 0 : i32
    return %c0_i32, %c0_i32_0 : i32, i32
  }
  func.func @transform_7(%arg0: i32, %arg1: i32) -> i32 {
    %c0_i32 = arith.constant 0 : i32
    %c0_i32_0 = arith.constant 0 : i32
    return %c0_i32 : i32
  }
  func.func @transform_8(%arg0: i32, %arg1: i32) -> (i32, i32, i32) {
    %c0_i32 = arith.constant 0 : i32
    %c0_i32_0 = arith.constant 0 : i32
    return %arg0, %arg1, %c0_i32 : i32, i32, i32
  }
  func.func @transform_9(%arg0: i32, %arg1: i32) -> (i32, i32, i32) {
    %c0_i32 = arith.constant 0 : i32
    %c0_i32_0 = arith.constant 0 : i32
    return %arg0, %arg1, %c0_i32 : i32, i32, i32
  }
  func.func @transform_10(%arg0: i32, %arg1: i32) -> (i32, i32, i32) {
    %c0_i32 = arith.constant 0 : i32
    %c0_i32_0 = arith.constant 0 : i32
    return %arg0, %arg1, %c0_i32 : i32, i32, i32
  }
  func.func @transform_11(%arg0: i32, %arg1: i32) -> (i32, i32, i32) {
    %c0_i32 = arith.constant 0 : i32
    %c0_i32_0 = arith.constant 0 : i32
    return %arg0, %arg1, %c0_i32 : i32, i32, i32
  }
}

</mosaic_0001>

<bundles_post_ra>
// kernel: tpu_custom_call.1
= control target key start
LH: loop header
LB: loop body
LE: loop exit
PB: predicated region body
PF: predicated region fallthrough
CT: control target
= control target key end

     0   :  { %s1654_s0 = inlined_call_operand.vmem [shape: f32[2,8,32], index: 0, kind: input, shape index: {}]   ;;  %s1655_s1 = inlined_call_operand.vmem [shape: f32[32,64], index: 1, kind: input, shape index: {}]   ;;  %s1656_s2 = inlined_call_operand.vmem [shape: f32[32,16], index: 2, kind: input, shape index: {}]   ;;  %s1657_s3 = inlined_call_operand.vmem [shape: f32[1,64], index: 3, kind: input, shape index: {}]   ;;  %s1658_s4 = inlined_call_operand.vmem [shape: f32[1,16], index: 4, kind: input, shape index: {}]   ;;  %s1659_s5 = inlined_call_operand.vmem [shape: f32[2,16], index: 5, kind: input, shape index: {}]   ;;  %s1660_s6 = inlined_call_operand.vmem [shape: f32[2,16], index: 6, kind: input, shape index: {}]   ;;  %s1661_s7 = inlined_call_operand.vmem [shape: f32[2], index: 7, kind: input, shape index: {}]   ;;  %s1662_s8 = inlined_call_operand.hbm [shape: f32[2,8,32], index: 8, kind: output, shape index: {0}]   ;;  %s1663_s9 = inlined_call_operand.hbm [shape: f32[2,8,32], index: 9, kind: output, shape index: {1}]   ;;  %s1664_s10 = inlined_call_operand.hbm [shape: f32[2,8,16], index: 10, kind: output, shape index: {2}]   ;;  %s1665_s11 = inlined_call_operand.hbm [shape: f32[2,8,16], index: 11, kind: output, shape index: {3}]  }
   0x1   :  { %1668 = sst [smem:[#allocation15_spill]] %s1654_s0 }
   0x2   :  { %1669 = sst [smem:[#allocation16_spill]] %s1655_s1 }
   0x3   :  { %1670 = sst [smem:[#allocation17_spill]] %s1656_s2 }
   0x4   :  { %1671 = sst [smem:[#allocation18_spill]] %s1657_s3 }
   0x5   :  { %1672 = sst [smem:[#allocation19_spill]] %s1658_s4 }
   0x6   :  { %1673 = sst [smem:[#allocation20_spill]] %s1659_s5 }
   0x7   :  { %1674 = sst [smem:[#allocation21_spill]] %s1661_s7 }
   0x8   :  { %17 = vsyncpa [#allocation4], 0 }
   0x9   :  { %18 = vsyncpa [#allocation3], 0 }
   0xa   :  { %20 = vsyncpa [#allocation3 + $0x1], 0 }
   0xb   :  { %21 = vsyncpa [#allocation7], 0 }
   0xc   :  { %23 = vsyncpa [#allocation7 + $0x1], 0 }
   0xd   :  { %24 = vsyncpa [#allocation10], 0 }
   0xe   :  { %26 = vsyncpa [#allocation10 + $0x1], 0  ;;  %s1352_s17 = smov 0   ;;  %s1354_s18 = smov 0  }
   0xf   :  { %s1356_s19 = smov 0   ;;  %s1358_s20 = smov 0  }
  0x10   :  { %s1360_s21 = smov 0   ;;  %s1362_s22 = smov 0  }
  0x11 LB: > { %s1383_s23 = sadd.s32 4294967295, %s1281_s22   ;;  %s1666_s24 = sadd.s32 4294967294, %s1281_s22   ;;  %s1281_s22 = sphi %s1362_s22, %s32_s22   ;;  %s1277_s21 = sphi %s1360_s21, %s1691_s21   ;;  %s1273_s20 = sphi %s1358_s20, %s1690_s20   ;;  %s1269_s19 = sphi %s1356_s19, %s1689_s19   ;;  %s1265_s18 = sphi %s1354_s18, %s1688_s18   ;;  %s1261_s17 = sphi %s1352_s17, %s1687_s17  }
  0x12   : > { %s44_s25 = sadd.s32 1, %s1277_s21  ;;  %s228_s26 = sadd.s32 1, %s1269_s19 }
  0x13   : > { %p46_p0 = scmp.ge.s32.totalorder %s44_s25, 2  ;;  %p238_p1 = scmp.ne.s32.totalorder %s1269_s19, %s1265_s18 }
  0x14   : > { %p239_p2 = scmp.eq.s32.totalorder %s1383_s23, 1  ;;  %p244_p3 = scmp.ne.s32.totalorder %s1265_s18, %s1261_s17 }
  0x15   : > { %s1693_s25 = smov (%p46_p0, %s44_s25), 0  ;;  %p245_p5 = scmp.eq.s32.totalorder %s1666_s24, 1 }
  0x16   : > { %p1395_p4 = por %p239_p2, %p238_p1  ;;  %s223_s28 = ssub.s32 %s1277_s21, %s1693_s25 }
  0x17   : > { %p925_p6 = scmp.ge.s32.totalorder %s1281_s22, 1  ;;  %p226_p7 = scmp.eq.s32.totalorder %s223_s28, 0 }
  0x18   : > { %p1404_p8 = por %p245_p5, %p244_p3  ;;  %p336_p9 = scmp.lt.s32.totalorder %s1281_s22, 3 }
  0x19   : > { %s1410_s30 = scalar_select %p226_p7, %s1269_s19, %s228_s26  }
  0x1a   : > { %p1412_p10 = pnand %p925_p6, %p336_p9  ;;  %p1028_p11 = scmp.eq.s32.totalorder %s1383_s23, 0 }
  0x1b   : > { %s1678_s7 = sld [smem:[#allocation21_spill]] }
  0x1c   : > { %p1011_p12 = pneg %p1412_p10 }
  0x1e   : > { %p1012_p13 = pnand %p1028_p11, %p1011_p12 }
  0x20   : > { %p1094_p1 = pneg %p1012_p13 }
  0x21   : > { %s367_s15 = sshll.u32 %s1678_s7, 4  ;;  %s368_s15 = int_to_ptr.vmem [resolvable:$true] %s367_s15 }
  0x22   : > { %s1092_s16 = scalar_lea.vmem %s368_s15, 16  ;;  %p1100_p5 = scmp.lt.s32.totalorder %s368_s15, %s368_s15 }
  0x23   : > { %p1093_p0 = scmp.ne.s32.totalorder %s368_s15, %s1092_s16  ;;  %p1101_p6 = scmp.lt.s32.totalorder %s1092_s16, %s1092_s16 }
  0x25   : > { %p1095_p2 = pnand %p1094_p1, %p1093_p0  ;;  %p1102_p7 = por %p1101_p6, %p1100_p5 }
  0x27   : > { %p1096_p3 = pneg %p1095_p2 }
  0x29   : > { %p1103_p9 = pnand %p1102_p7, %p1096_p3 }
  0x2b   : > { %1106 = shalt.err (!%p1103_p9)
}
  0x2c   : > { %s1283_s26 = smov [#allocation2]   ;;  %390 = sbr.rel (%p1412_p10) target bundleno = 463 (0x1cf), region = 52 }
  0x2d   : > { %1014 = dma.vmem_to_smem (!%p1012_p13), %s368_s15, 16, %s1283_s26, [#allocation4]  }
  0x33   : > { %1244 = dma.done.wait (%p1028_p11), [#allocation4], 16  }
  0x34   : > { %1246 = vsyncadd (%p1028_p11), [#allocation4], 4294967280 }
  0x35   : > { %396 = sfence }
  0x36   : > { %s1679_s1 = sld [smem:[#allocation16_spill]]  ;;  %v1284_v3 = vmov 0.0|0.0   ;;  %vm1285_vm0 = vmmov 0   ;;  %v1286_v6 = vmov 0.0   ;;  %p448_p10 = scmp.lt.s32.totalorder %s1273_s20, 1  ;;  %vm467_vm1 = vcmask 261120  }
  0x37   : > { %987 = vmatprep.subr.bf16.mxu0 %v1284_v3  ;;  %973 = vmatprep.mubr.msk.f32.mxu0 %vm1285_vm0, %v1286_v6  ;;  %s1680_s2 = sld [smem:[#allocation17_spill]]  ;;  %s1681_s0 = sld [smem:[#allocation15_spill]]  ;;  %v942_v35 = vld [vmem:[%s1660_s6] ss:$0 sm:$0xff]  ;;  %v944_v36 = vld [vmem:[%s1660_s6 + $0x1] ss:$0 sm:$0xff] }
  0x38   : > { %993 = vmatprep.subr.bf16.mxu1 %v1284_v3  ;;  %984 = vmatprep.mubr.msk.f32.mxu1 %vm1285_vm0, %v1286_v6  ;;  %s1682_s3 = sld [smem:[#allocation18_spill]]  ;;  %s1683_s4 = sld [smem:[#allocation19_spill]] }
  0x39   : > { %s1474_s13 = sld [smem:[#allocation2 + %s1273_s20]]  ;;  %s1477_s14 = sshll.u32 %s1273_s20, 7 }
  0x3a   : > { %s1684_s5 = sld [smem:[#allocation20_spill]] }
  0x3c   : > { %v456_v0 = vld [vmem:[%s1679_s1] sm:$0xff]  ;;  %v457_v1 = vld [vmem:[%s1679_s1 + $0x8] sm:$0xff]  ;;  %v458_v2 = vld [vmem:[%s1679_s1 + $0x10] sm:$0xff] }
  0x3d   : > { %v988_v4 = vpack.c.bf16 %v457_v1, %v456_v0  ;;  %v459_v5 = vld [vmem:[%s1679_s1 + $0x18] sm:$0xff]  ;;  %v548_v7 = vld [vmem:[%s1680_s2] sm:$0xff]  ;;  %v549_v8 = vld [vmem:[%s1680_s2 + $0x8] sm:$0xff]  ;;  %s449_s1 = scalar_select %p448_p10, %s1273_s20, 1 }
  0x3e   : > { %v994_v9 = vpack.c.bf16 %v549_v8, %v548_v7  ;;  %v550_v10 = vld [vmem:[%s1680_s2 + $0x10] sm:$0xff]  ;;  %v551_v11 = vld [vmem:[%s1680_s2 + $0x18] sm:$0xff]  ;;  %v991_v12 = vpack.c.bf16 %v459_v5, %v458_v2  ;;  %v935_v15 = vld [vmem:[%s1682_s3] ss:$0 sm:$0xff]  ;;  %s1490_s3 = scalar_lea.hbm %s1662_s8, %s1477_s14 }
  0x3f   : > { %989 = vmatpush3.bf16.msra.mxu0 %v988_v4  ;;  %v997_v13 = vpack.c.bf16 %v551_v11, %v550_v10  ;;  %s934_s28 = sshll.u32 %s449_s1, 3  ;;  %v938_v16 = vld [vmem:[%s1683_s4] ss:$0 sm:$0xff]  ;;  %s1468_s1 = sand.u32 1, %s1265_s18  }
  0x40   : > { %990 = vmatprep.subr.bf16.mxu0 %v1284_v3  ;;  %995 = vmatpush3.bf16.msra.mxu1 %v994_v9  ;;  %s454_s16 = scalar_lea.vmem %s1681_s0, %s934_s28  ;;  %s1471_s28 = sshll.u32 %s1468_s1, 3  ;;  %v941_v32 = vld [vmem:[%s1684_s5] ss:$0 sm:$0xff]  ;;  %v943_v33 = vld [vmem:[%s1684_s5 + $0x1] ss:$0 sm:$0xff] }
  0x41   : > { %996 = vmatprep.subr.bf16.mxu1 %v1284_v3  ;;  %v455_v14 = vld [vmem:[%s454_s16] sm:$0xff]  ;;  %s426_s16 = scalar_lea.vmem [#allocation5], %s1471_s28  ;;  %s1287_s4 = smov 96  }
  0x42   : > { %s702_s15 = sshll.u32 %s426_s16, 4  ;;  %s1667_s2 = scalar_lea.vmem [#allocation9], %s1471_s28  ;;  %s1492_s15 = int_to_ptr.vmem [resolvable:$true] %s702_s15 }
  0x43   : > { %992 = vmatpush3.bf16.msra.mxu0 %v991_v12  ;;  %s1504_s12 = sshll.u32 %s1667_s2, 4  ;;  %s673_s20 = scalar_lea.sflag [#allocation3], %s1468_s1  ;;  %s1536_s12 = int_to_ptr.vmem [resolvable:$true] %s1504_s12 }
  0x44   : > { %998 = vmatpush3.bf16.msra.mxu1 %v997_v13  ;;  %s1107_s5 = scalar_lea.vmem %s1492_s15, 128 }
  0x45   : > { %p1108_p11 = scmp.ne.s32.totalorder %s1492_s15, %s1107_s5 }
  0x46   : > { %974 = vmatmul.mubr.msk.f32.vlgmr.msra.gmra.mrb[0].mxu0 %vm467_vm1, %v455_v14 }
  0x47   : > { %985 = vmatmul.mubr.msk.f32.vlgmr.msra.gmra.mrb[0].mxu1 %vm467_vm1, %v455_v14  ;;  %p1109_p12 = pnand %p1108_p11, %p1395_p4 }
  0x49   : > { %p1110_p13 = pneg %p1109_p12 }
 0x119   : > { %v537_v17 = vpop.f32.mrb[0].mxu0 }
 0x11a   : > { %v538_v18 = vadd.f32 %v935_v15, %v537_v17  ;;  %v975_v19 = vpop.f32.mrb[1].mxu0  ;;  %v625_v20 = vpop.f32.mrb[0].mxu1 }
 0x11b   : > { %v626_v21 = vadd.f32 %v938_v16, %v625_v20  ;;  %v986_v22 = vpop.f32.mrb[1].mxu1 }
 0x11c   : > { %v937_v23 = vmul.f32 -1.442695, %v538_v18 }
 0x11d   : > { %v940_v24 = vmul.f32 -1.442695, %v626_v21 }
 0x11e   : > { %1084 = vpow2.f32 %v937_v23 }
 0x11f   : > { %1086 = vpow2.f32 %v940_v24 }
 0x128   : > { %v1085_v25 = vpop.eup %1084 }
 0x129   : > { %v1087_v26 = vpop.eup %1086  ;;  %v544_v27 = vadd.f32 1.0, %v1085_v25 }
 0x12a   : > { %v632_v28 = vadd.f32 1.0, %v1087_v26 }
 0x12b   : > { %1088 = vrcp.f32 %v544_v27 }
 0x12c   : > { %1090 = vrcp.f32 %v632_v28 }
 0x135   : > { %v1089_v29 = vpop.eup %1088 }
 0x136   : > { %v1091_v30 = vpop.eup %1090  ;;  %v547_v31 = vmul.f32 %v1089_v29, %v538_v18 }
 0x137   : > { %v635_v34 = vmul.f32 %v1091_v30, %v626_v21 }
 0x138   : > { %638 = vrot.lane.b32.xlu0 %v547_v31, %s1287_s4  ;;  %636 = vst.msk [vmem:[%s426_s16] sm:$0xff] %vm467_vm1, %v547_v31  ;;  %s1288_s4 = smov [#allocation5]  }
 0x139   : > { %v648_v37 = vmul.f32 %v941_v32, %v635_v34  ;;  %v664_v38 = vmul.f32 %v943_v33, %v635_v34  ;;  %s1111_s7 = sshll.u32 %s1288_s4, 4  ;;  %s1112_s7 = int_to_ptr.vmem [resolvable:$false] %s1111_s7 }
 0x13a   : > { %s1113_s26 = scalar_lea.vmem %s1112_s7, 256  ;;  %p1114_p0 = scmp.lt.s32.totalorder %s1492_s15, %s1112_s7 }
 0x13b   : > { %p1115_p1 = scmp.lt.s32.totalorder %s1113_s26, %s1107_s5 }
 0x13d   : > { %p1116_p2 = por %p1115_p1, %p1114_p0 }
 0x13f   : > { %p1117_p3 = pnand %p1116_p2, %p1110_p13 }
 0x141   : > { %1120 = shalt.err (!%p1117_p3)
}
 0x142   : > { %s1121_s16 = scalar_lea.hbm %s1490_s3, 128  ;;  %s1125_s4 = scalar_lea.hbm %s1662_s8, 256 }
 0x143   : > { %p1122_p5 = scmp.ne.s32.totalorder %s1490_s3, %s1121_s16  ;;  %p1126_p9 = scmp.lt.u32.totalorder %s1490_s3, %s1662_s8 }
 0x144   : > { %p1127_p10 = scmp.lt.u32.totalorder %s1125_s4, %s1121_s16  ;;  %p1129_p12 = scmp.lt.u32.totalorder %s1121_s16, %s1490_s3 }
 0x145   : > { %p1123_p6 = pnand %p1122_p5, %p1395_p4 }
 0x146   : > { %p1128_p11 = por %p1127_p10, %p1126_p9 }
 0x147   : > { %p1124_p7 = pneg %p1123_p6 }
 0x148   : > { %p1130_p13 = por %p1129_p12, %p1128_p11 }
 0x14a   : > { %p1131_p0 = pnand %p1130_p13, %p1124_p7 }
 0x14c   : > { %1134 = shalt.err (!%p1131_p0)
}
 0x14d   : > { %1003 = dma.vmem_to_hbm [thread:$0]  (%p1395_p4), %s1492_s15, 128, %s1490_s3, %s673_s20   ;;  %v655_v39 = vstv %s1474_s13  ;;  %vm657_vm2 = vcmask 130048   ;;  %v654_v40 = vadd.f32 %v942_v35, %v648_v37  ;;  %v670_v41 = vadd.f32 %v944_v36, %v664_v38 }
 0x14e   : > { %s1533_s26 = scalar_lea.hbm %s1665_s11, %s1477_s14  ;;  %s1685_s16 = scalar_lea.vmem [#allocation9], %s1471_s28 }
 0x14f   : > { %v656_v42 = vmul.f32 %v655_v39, %v654_v40  ;;  %671 = vst.msk [vmem:[%s1685_s16] sm:$0xff] %vm657_vm2, %v670_v41  ;;  %s688_s24 = scalar_lea.sflag [#allocation10], %s1468_s1  ;;  %s1135_s3 = scalar_lea.vmem %s1536_s12, 128 }
 0x150   : > { %p1136_p1 = scmp.ne.s32.totalorder %s1536_s12, %s1135_s3  ;;  %s1289_s13 = smov [#allocation9]  }
 0x151   : > { %s1139_s15 = sshll.u32 %s1289_s13, 4  ;;  %s1140_s15 = int_to_ptr.vmem [resolvable:$false] %s1139_s15 }
 0x152   : > { %p1137_p2 = pnand %p1136_p1, %p1395_p4  ;;  %s1141_s20 = scalar_lea.vmem %s1140_s15, 256 }
 0x153   : > { %p1142_p5 = scmp.lt.s32.totalorder %s1536_s12, %s1140_s15  ;;  %p1143_p6 = scmp.lt.s32.totalorder %s1141_s20, %s1135_s3 }
 0x154   : > { %p1138_p3 = pneg %p1137_p2 }
 0x155   : > { %p1144_p7 = por %p1143_p6, %p1142_p5 }
 0x157   : > { %p1145_p9 = pnand %p1144_p7, %p1138_p3 }
 0x159   : > { %1148 = shalt.err (!%p1145_p9)
}
 0x15a   : > { %s1149_s1 = scalar_lea.hbm %s1533_s26, 128  ;;  %s1153_s7 = scalar_lea.hbm %s1665_s11, 256 }
 0x15b   : > { %p1150_p10 = scmp.ne.s32.totalorder %s1533_s26, %s1149_s1  ;;  %p1154_p13 = scmp.lt.u32.totalorder %s1533_s26, %s1665_s11 }
 0x15c   : > { %p1155_p0 = scmp.lt.u32.totalorder %s1153_s7, %s1149_s1  ;;  %p1157_p2 = scmp.lt.u32.totalorder %s1149_s1, %s1533_s26 }
 0x15d   : > { %p1151_p11 = pnand %p1150_p10, %p1395_p4 }
 0x15e   : > { %p1156_p1 = por %p1155_p0, %p1154_p13 }
 0x15f   : > { %p1152_p12 = pneg %p1151_p11 }
 0x160   : > { %p1158_p3 = por %p1157_p2, %p1156_p1 }
 0x162   : > { %p1159_p5 = pnand %p1158_p3, %p1152_p12 }
 0x164   : > { %1162 = shalt.err (!%p1159_p5)
}
 0x165   : > { %1006 = dma.vmem_to_hbm [thread:$0]  (%p1395_p4), %s1536_s12, 128, %s1533_s26, %s688_s24  }
 0x166   : > { %s440_s16 = scalar_lea.vmem [#allocation8], %s1471_s28  ;;  %s677_s3 = sand.u32 1, %s1383_s23  }
 0x167   : > { %658 = vst.msk [vmem:[%s440_s16] sm:$0xff] %vm657_vm2, %v656_v42  ;;  %s433_s13 = scalar_lea.vmem [#allocation6], %s1471_s28  ;;  %s730_s20 = sshll.u32 %s440_s16, 4  ;;  %s1581_s20 = int_to_ptr.vmem [resolvable:$true] %s730_s20 }
 0x168   : > { %s716_s15 = sshll.u32 %s433_s13, 4  ;;  %s1571_s4 = scalar_lea.hbm %s1663_s9, %s1477_s14  ;;  %s1573_s15 = int_to_ptr.vmem [resolvable:$true] %s716_s15 }
 0x169   : > { %s1579_s24 = scalar_lea.hbm %s1664_s10, %s1477_s14  ;;  %s1584_s23 = scalar_lea.sflag [#allocation7], %s677_s3 }
 0x16a   : > { %s1163_s28 = scalar_lea.vmem %s1573_s15, 128  ;;  %s1290_s7 = smov [#allocation6]  }
 0x16b   : > { %p1164_p6 = scmp.ne.s32.totalorder %s1573_s15, %s1163_s28  ;;  %s1167_s5 = sshll.u32 %s1290_s7, 4  ;;  %s1168_s5 = int_to_ptr.vmem [resolvable:$false] %s1167_s5 }
 0x16c   : > { %s1169_s2 = scalar_lea.vmem %s1168_s5, 256  ;;  %p1170_p10 = scmp.lt.s32.totalorder %s1573_s15, %s1168_s5 }
 0x16d   : > { %p1165_p7 = pnand %p1164_p6, %p1395_p4  ;;  %p1171_p11 = scmp.lt.s32.totalorder %s1169_s2, %s1163_s28 }
 0x16f   : > { %p1166_p9 = pneg %p1165_p7  ;;  %p1172_p12 = por %p1171_p11, %p1170_p10 }
 0x171   : > { %p1173_p13 = pnand %p1172_p12, %p1166_p9 }
 0x1aa   : > { %v639_v43 = vpop.permute.xlu0 %638 }
 0x1ab   : > { %641 = vst.msk [vmem:[%s433_s13] sm:$0xff] %vm467_vm1, %v639_v43 }
 0x1ac   : > { %1176 = shalt.err (!%p1173_p13)
}
 0x1ad   : > { %s1177_s14 = scalar_lea.hbm %s1571_s4, 128  ;;  %s1181_s13 = scalar_lea.hbm %s1663_s9, 256 }
 0x1ae   : > { %p1178_p0 = scmp.ne.s32.totalorder %s1571_s4, %s1177_s14  ;;  %p1182_p3 = scmp.lt.u32.totalorder %s1571_s4, %s1663_s9 }
 0x1af   : > { %p1183_p5 = scmp.lt.u32.totalorder %s1181_s13, %s1177_s14  ;;  %p1185_p7 = scmp.lt.u32.totalorder %s1177_s14, %s1571_s4 }
 0x1b0   : > { %p1179_p1 = pnand %p1178_p0, %p1395_p4 }
 0x1b1   : > { %p1184_p6 = por %p1183_p5, %p1182_p3 }
 0x1b2   : > { %p1180_p2 = pneg %p1179_p1 }
 0x1b3   : > { %p1186_p9 = por %p1185_p7, %p1184_p6 }
 0x1b5   : > { %p1187_p10 = pnand %p1186_p9, %p1180_p2 }
 0x1b7   : > { %1190 = shalt.err (!%p1187_p10)
}
 0x1b8   : > { %1004 = dma.vmem_to_hbm [thread:$0]  (%p1395_p4), %s1573_s15, 128, %s1571_s4, %s1584_s23  }
 0x1b9   : > { %s1191_s12 = scalar_lea.vmem %s1581_s20, 128  ;;  %s1291_s26 = smov [#allocation8]  }
 0x1ba   : > { %p1192_p11 = scmp.ne.s32.totalorder %s1581_s20, %s1191_s12  ;;  %s1195_s28 = sshll.u32 %s1291_s26, 4  ;;  %s1196_s28 = int_to_ptr.vmem [resolvable:$false] %s1195_s28 }
 0x1bb   : > { %s1197_s7 = scalar_lea.vmem %s1196_s28, 256  ;;  %p1198_p0 = scmp.lt.s32.totalorder %s1581_s20, %s1196_s28 }
 0x1bc   : > { %p1193_p12 = pnand %p1192_p11, %p1395_p4  ;;  %p1199_p1 = scmp.lt.s32.totalorder %s1197_s7, %s1191_s12 }
 0x1be   : > { %p1194_p13 = pneg %p1193_p12  ;;  %p1200_p2 = por %p1199_p1, %p1198_p0 }
 0x1c0   : > { %p1201_p3 = pnand %p1200_p2, %p1194_p13 }
 0x1c2   : > { %1204 = shalt.err (!%p1201_p3)
}
 0x1c3   : > { %s1205_s15 = scalar_lea.hbm %s1579_s24, 128  ;;  %s1209_s2 = scalar_lea.hbm %s1664_s10, 256 }
 0x1c4   : > { %p1206_p5 = scmp.ne.s32.totalorder %s1579_s24, %s1205_s15  ;;  %p1210_p9 = scmp.lt.u32.totalorder %s1579_s24, %s1664_s10 }
 0x1c5   : > { %p1211_p10 = scmp.lt.u32.totalorder %s1209_s2, %s1205_s15  ;;  %p1213_p12 = scmp.lt.u32.totalorder %s1205_s15, %s1579_s24 }
 0x1c6   : > { %p1207_p6 = pnand %p1206_p5, %p1395_p4 }
 0x1c7   : > { %p1212_p11 = por %p1211_p10, %p1210_p9 }
 0x1c8   : > { %p1208_p7 = pneg %p1207_p6 }
 0x1c9   : > { %p1214_p13 = por %p1213_p12, %p1212_p11 }
 0x1cb   : > { %p1215_p0 = pnand %p1214_p13, %p1208_p7 }
 0x1cd   : > { %1218 = shalt.err (!%p1215_p0)
}
 0x1ce   : > { %1005 = dma.vmem_to_hbm [thread:$0]  (%p1395_p4), %s1581_s20, 128, %s1579_s24, %s1584_s23  }
 0x1cf PF: > { %p1030_p1 = scmp.ge.s32.totalorder %s1281_s22, 2  ;;  %s756_s3 = sand.u32 1, %s1261_s17  }
 0x1d0   : > { %s757_s13 = scalar_lea.sflag [#allocation3], %s756_s3 }
 0x1d1   : > { %p1016_p2 = pnand %p1030_p1, %p1404_p8 }
 0x1d3   : > { %1248 = dma.done.wait (!%p1016_p2), %s757_s13, 128  }
 0x1d4   : > { %1250 = vsyncadd (!%p1016_p2), %s757_s13, 4294967168  ;;  %s1686_s1 = sadd.s32 4294967294, %s1281_s22  }
 0x1d5   : > { %s765_s0 = sand.u32 1, %s1686_s1  }
 0x1d6   : > { %s766_s12 = scalar_lea.sflag [#allocation7], %s765_s0 }
 0x1d7   : > { %1252 = dma.done.wait (!%p1016_p2), %s766_s12, 256  }
 0x1d8   : > { %1254 = vsyncadd (!%p1016_p2), %s766_s12, 4294967040  ;;  %s784_s27 = scalar_lea.sflag [#allocation10], %s756_s3 }
 0x1d9   : > { %1256 = dma.done.wait (!%p1016_p2), %s784_s27, 128  }
 0x1da   : > { %1258 = vsyncadd (!%p1016_p2), %s784_s27, 4294967168  ;;  %s32_s22 = sadd.s32 1, %s1281_s22   ;;  %s1687_s17 = smov %s1265_s18 }
 0x1db   : > { %p29_p4 = scmp.ge.s32.totalorder %s32_s22, 4   ;;  %s1688_s18 = smov %s1269_s19 }
 0x1dc   : > { %s1689_s19 = smov %s1410_s30  ;;  %s1690_s20 = smov %s1277_s21 }
 0x1dd   : > { %s1691_s21 = smov %s1693_s25  ;;  %31 = sbr.rel (!%p29_p4) target bundleno = 17 (0x11), region = 141 }
 0x1e4   :  { %789 = vsyncpa [#allocation3], 1 }
 0x1e5   :  { %791 = vsyncpa [#allocation3 + $0x1], 1 }
 0x1e6   :  { %792 = vsyncpa [#allocation7], 1 }
 0x1e7   :  { %794 = vsyncpa [#allocation7 + $0x1], 1 }
 0x1e8   :  { %795 = vsyncpa [#allocation10], 1 }
 0x1e9   :  { %797 = vsyncpa [#allocation10 + $0x1], 1 }
 0x1ea   :  { %798 = vsyncpa [#allocation4], 1 }
 0x1eb   :  { %800 = vsyncpa [#allocation4 + $0x1], 1 }

</bundles_post_ra>
